<compile_context>
chip_gen: v7x
topology: tpu7x:2x2x1
jax: 0.10.0
libtpu: 0.0.40
codegen_flags: <defaults>
</compile_context>

<pallas_src>
import jax
import jax.numpy as jnp
from jax.experimental import pallas as pl
from jax.experimental.pallas import tpu as pltpu


MAX_TILE_N = 8192            # batch elements per grid step (= 16384 lanes)


# --------------------------------------------------------------------------
# Kernel
# --------------------------------------------------------------------------
def net_tile_kernel(x_ref, w1_ref, b1_ref, w2_ref, fw1_ref, fb1_ref,
                    fw2_ref, fb2_ref, o_ref):
    # x_ref / o_ref: (1, W) f32; lanes interleave (pos0, pos1) per batch elem.
    w = x_ref.shape[1]
    x = x_ref[...]

    lane = jax.lax.broadcasted_iota(jnp.int32, (1, w), 1)
    even = jnp.bitwise_and(lane, 1) == 0           # lane parity == position id

    # Duplicate each pair's pos0 / pos1 value onto both of its lanes.
    # (Lane shift + parity select; wrapped lanes are never selected and pairs
    # never straddle a block boundary since block widths are 256-aligned.)
    prv = jnp.roll(x, 1, axis=1)                   # prv[l] = x[l-1]
    nxt = jnp.roll(x, -1, axis=1)                  # nxt[l] = x[l+1]
    x0 = jnp.where(even, x, prv)                   # position 0, duplicated
    x1 = jnp.where(even, nxt, x)                   # position 1, duplicated

    # conv1 (in_ch=1, k=1) + ReLU, per position.                    (16, W)
    w1 = w1_ref[...]
    b1 = b1_ref[...]
    h1_0 = jnp.maximum(w1 * x0 + b1, 0.0).astype(jnp.bfloat16)
    h1_1 = jnp.maximum(w1 * x1 + b1, 0.0).astype(jnp.bfloat16)

    # conv2 (k=1) as MXU matmuls; conv2's bias is folded into fc1's bias
    # offline (valid: no ReLU between conv2 and fc1 in the spec).    (32, W)
    w2 = w2_ref[...]
    h2_0 = jnp.dot(w2, h1_0, preferred_element_type=jnp.float32)
    h2_1 = jnp.dot(w2, h1_1, preferred_element_type=jnp.float32)

    # max_pool1d(kernel=2) over the two positions; dropout1: identity (eval).
    m = jnp.maximum(h2_0, h2_1).astype(jnp.bfloat16)                # (32, W)

    # flatten(1) is a no-op in this layout.  fc1 + ReLU; dropout2: identity.
    y1 = jnp.dot(fw1_ref[...], m, preferred_element_type=jnp.float32) + fb1_ref[...]
    y1 = jnp.maximum(y1, 0.0).astype(jnp.bfloat16)                  # (16, W)

    # fc2 logits.                                                    (2, W)
    z = jnp.dot(fw2_ref[...], y1, preferred_element_type=jnp.float32) + fb2_ref[...]

    # Re-interleave: even lanes carry class-0, odd lanes class-1 logits, so the
    # flat output reshapes straight into the PyTorch (N, 2) layout.
    o_ref[...] = jnp.where(even, z[0:1, :], z[1:2, :])


# --------------------------------------------------------------------------
# Parameter construction / packing
# --------------------------------------------------------------------------
def make_params(key):
    """PyTorch-default-like uniform init, PyTorch-native shapes."""
    ks = jax.random.split(key, 8)

    def uni(k, shape, fan_in):
        bound = 1.0 / jnp.sqrt(jnp.float32(fan_in))
        return jax.random.uniform(k, shape, jnp.float32, -bound, bound)

    w1 = uni(ks[0], (16, 1, 1), 1)     # conv1.weight
    b1 = uni(ks[1], (16,), 1)          # conv1.bias
    w2 = uni(ks[2], (32, 16, 1), 16)   # conv2.weight
    b2 = uni(ks[3], (32,), 16)         # conv2.bias
    fw1 = uni(ks[4], (16, 32), 32)     # fc1.weight
    fb1 = uni(ks[5], (16,), 32)        # fc1.bias
    fw2 = uni(ks[6], (2, 16), 16)      # fc2.weight
    fb2 = uni(ks[7], (2,), 16)         # fc2.bias
    return (w1, b1, w2, b2, fw1, fb1, fw2, fb2)


def prepare_params(params):
    """Pre-pack kernel-ready parameters: bf16 matmul operands, broadcast-ready
    bias columns, and conv2's bias folded into fc1's bias (no ReLU after conv2
    in the spec, so fb1' = fb1 + fw1 @ b2 is exact)."""
    w1, b1, w2, b2, fw1, fb1, fw2, fb2 = params
    w1c = w1[:, 0, 0].reshape(16, 1).astype(jnp.float32)        # conv1 weight
    b1c = b1.reshape(16, 1).astype(jnp.float32)                 # conv1 bias
    w2m = w2[:, :, 0].astype(jnp.bfloat16)                      # conv2 weight (32,16)
    fw1m = fw1.astype(jnp.bfloat16)                             # fc1 weight   (16,32)
    fb1c = (fb1 + fw1 @ b2).reshape(16, 1).astype(jnp.float32)  # fc1 bias + fw1@b2
    fw2m = fw2.astype(jnp.bfloat16)                             # fc2 weight   (2,16)
    fb2c = fb2.reshape(2, 1).astype(jnp.float32)                # fc2 bias
    return (w1c, b1c, w2m, fw1m, fb1c, fw2m, fb2c)


# --------------------------------------------------------------------------
# Forward wrapper
# --------------------------------------------------------------------------
def _round_up(v, m):
    return ((v + m - 1) // m) * m


def _choose_tiling(total_pad):
    """Lanes per grid step: as big as VMEM comfortably allows; >=2 steps when
    there is enough work so the parallel axis can feed both v7x TensorCores."""
    max_w = 2 * MAX_TILE_N
    min_steps = 2 if total_pad >= 4096 else 1
    steps = max(min_steps, pl.cdiv(total_pad, max_w))
    block_w = _round_up(pl.cdiv(total_pad, steps), 256)
    steps = pl.cdiv(total_pad, block_w)
    return block_w, steps


def net_forward(x_ncl, kernel_params):
    """x_ncl: (N, 1, 2) float32, mirroring the PyTorch Conv1d NCL input."""
    w1c, b1c, w2m, fw1m, fb1c, fw2m, fb2c = kernel_params
    n = x_ncl.shape[0]
    total = 2 * n
    # Natural row-major flatten: lanes = [b0p0, b0p1, b1p0, b1p1, ...] (free).
    x_flat = x_ncl.astype(jnp.float32).reshape(1, total)
    # Pad the batch only to lane granularity (128 elems -> 256 lanes).
    total_pad = _round_up(total, 256)
    if total_pad != total:
        x_flat = jnp.pad(x_flat, ((0, 0), (0, total_pad - total)))

    block_w, steps = _choose_tiling(total_pad)
    const = lambda i: (0, 0)

    out_flat = pl.pallas_call(
        net_tile_kernel,
        out_shape=jax.ShapeDtypeStruct((1, total_pad), jnp.float32),
        grid=(steps,),
        in_specs=[
            pl.BlockSpec((1, block_w), lambda i: (0, i)),
            # Resident parameters (constant index_map -> DMA'd once).
            pl.BlockSpec((16, 1), const),     # conv1 weight column (f32)
            pl.BlockSpec((16, 1), const),     # conv1 bias column   (f32)
            pl.BlockSpec((32, 16), const),    # conv2 weight        (bf16)
            pl.BlockSpec((16, 32), const),    # fc1 weight          (bf16)
            pl.BlockSpec((16, 1), const),     # fc1 bias (+ fw1 @ conv2 bias)
            pl.BlockSpec((2, 16), const),     # fc2 weight          (bf16)
            pl.BlockSpec((2, 1), const),      # fc2 bias            (f32)
        ],
        out_specs=pl.BlockSpec((1, block_w), lambda i: (0, i)),
        compiler_params=pltpu.CompilerParams(
            dimension_semantics=("parallel",),
            vmem_limit_bytes=32 * 1024 * 1024),
    )(x_flat, w1c, b1c, w2m, fw1m, fb1c, fw2m, fb2c)

    # Interleaved logits -> (N, 2) is a free reshape (no transpose HBM pass).
    logits = out_flat[0, :total].reshape(n, 2)
    # F.softmax(x, dim=0) couples the entire batch; per the perf review this
    # cross-tile reduction is left to XLA, which fuses slice + softmax into a
    # single memory-bound pass (exact division, no approx reciprocal).
    return jax.nn.softmax(logits, axis=0)


# --------------------------------------------------------------------------
# Pure-JAX reference (f32) for a correctness sanity check
# --------------------------------------------------------------------------
def net_reference(x_ncl, params):
    w1, b1, w2, b2, fw1, fb1, fw2, fb2 = params
    xs = x_ncl[:, 0, :].astype(jnp.float32)                        # (N, 2)
    h1 = jnp.maximum(xs[:, None, :] * w1[:, 0, 0][None, :, None]
                     + b1[None, :, None], 0.0)                     # (N, 16, 2)
    h2 = jnp.einsum("dc,ncl->ndl", w2[:, :, 0], h1) + b2[None, :, None]
    m = jnp.max(h2, axis=2)                                        # (N, 32)
    y1 = jnp.maximum(m @ fw1.T + fb1, 0.0)                         # (N, 16)
    y2 = y1 @ fw2.T + fb2                                          # (N, 2)
    return jax.nn.softmax(y2, axis=0)


if __name__ == "__main__":
    key = jax.random.PRNGKey(0)
    k_x, k_p = jax.random.split(key)

    N = 8
    x = jax.random.normal(k_x, (N, 1, 2), dtype=jnp.float32)   # (batch, C=1, L=2)
    params = make_params(k_p)
    kparams = prepare_params(params)

    out = jax.jit(net_forward)(x, kparams)
    out = jax.block_until_ready(out)

    ref = net_reference(x, params)
    assert out.shape == (N, 2)
    assert bool(jnp.all(jnp.isfinite(out)))
    # softmax over dim=0 -> each class column sums to 1 (exact division).
    assert jnp.allclose(jnp.sum(out, axis=0), jnp.ones((2,)), atol=1e-4)
    # loose tolerance: bf16 matmul operands with f32 accumulation.
    assert jnp.allclose(out, ref, atol=2e-2, rtol=5e-2)
    # TODO(synk): dropout layers are identity (eval mode); train-mode RNG
    # dropout is not implemented.
    print("KERNEL_OK")
</pallas_src>

<mosaic_0001>
module attributes {stable_mosaic.version = 11 : i64} {
  func.func @net_tile_kernel(%arg0: i32, %arg1: memref<1x256xf32, #tpu.memory_space<vmem>>, %arg2: memref<16x1xf32, #tpu.memory_space<vmem>>, %arg3: memref<16x1xf32, #tpu.memory_space<vmem>>, %arg4: memref<32x16xbf16, #tpu.memory_space<vmem>>, %arg5: memref<16x32xbf16, #tpu.memory_space<vmem>>, %arg6: memref<16x1xf32, #tpu.memory_space<vmem>>, %arg7: memref<2x16xbf16, #tpu.memory_space<vmem>>, %arg8: memref<2x1xf32, #tpu.memory_space<vmem>>, %arg9: memref<1x256xf32, #tpu.memory_space<vmem>>) attributes {dimension_semantics = [#tpu.dimension_semantics<parallel>], iteration_bounds = array<i64: 1>, scalar_prefetch = 0 : i64, scratch_operands = 0 : i64, tpu.core_type = #tpu.core_type<tc>, window_params = [{transform_indices = @transform_0, window_bounds = array<i64: 1, 256>}, {pipeline_mode = #tpu.pipeline_mode<synchronous>, transform_indices = @transform_1, window_bounds = array<i64: 16, 1>}, {pipeline_mode = #tpu.pipeline_mode<synchronous>, transform_indices = @transform_2, window_bounds = array<i64: 16, 1>}, {pipeline_mode = #tpu.pipeline_mode<synchronous>, transform_indices = @transform_3, window_bounds = array<i64: 32, 16>}, {pipeline_mode = #tpu.pipeline_mode<synchronous>, transform_indices = @transform_4, window_bounds = array<i64: 16, 32>}, {pipeline_mode = #tpu.pipeline_mode<synchronous>, transform_indices = @transform_5, window_bounds = array<i64: 16, 1>}, {pipeline_mode = #tpu.pipeline_mode<synchronous>, transform_indices = @transform_6, window_bounds = array<i64: 2, 16>}, {pipeline_mode = #tpu.pipeline_mode<synchronous>, transform_indices = @transform_7, window_bounds = array<i64: 2, 1>}, {transform_indices = @transform_8, window_bounds = array<i64: 1, 256>}]} {
    %c0 = arith.constant 0 : index
    %c0_0 = arith.constant 0 : index
    %0 = vector.load %arg1[%c0, %c0_0] : memref<1x256xf32, #tpu.memory_space<vmem>>, vector<1x256xf32>
    %1 = tpu.iota {dimensions = array<i32: 1>} : vector<1x256xi32>
    %c1_i32 = arith.constant 1 : i32
    %2 = vector.broadcast %c1_i32 : i32 to vector<1x256xi32>
    %3 = arith.andi %1, %2 : vector<1x256xi32>
    %c0_i32 = arith.constant 0 : i32
    %4 = vector.broadcast %c0_i32 : i32 to vector<1x256xi32>
    %5 = arith.cmpi eq, %3, %4 : vector<1x256xi32>
    %6 = vector.extract_strided_slice %0 {offsets = [0, 255], sizes = [1, 1], strides = [1, 1]} : vector<1x256xf32> to vector<1x1xf32>
    %7 = vector.extract_strided_slice %0 {offsets = [0, 0], sizes = [1, 255], strides = [1, 1]} : vector<1x256xf32> to vector<1x255xf32>
    %8 = tpu.concatenate %6, %7 in 1 : vector<1x1xf32>, vector<1x255xf32> -> vector<1x256xf32>
    %9 = vector.extract_strided_slice %0 {offsets = [0, 1], sizes = [1, 255], strides = [1, 1]} : vector<1x256xf32> to vector<1x255xf32>
    %10 = vector.extract_strided_slice %0 {offsets = [0, 0], sizes = [1, 1], strides = [1, 1]} : vector<1x256xf32> to vector<1x1xf32>
    %11 = tpu.concatenate %9, %10 in 1 : vector<1x255xf32>, vector<1x1xf32> -> vector<1x256xf32>
    %12 = arith.select %5, %0, %8 : vector<1x256xi1>, vector<1x256xf32>
    %13 = arith.select %5, %11, %0 : vector<1x256xi1>, vector<1x256xf32>
    %c0_1 = arith.constant 0 : index
    %c0_2 = arith.constant 0 : index
    %14 = vector.load %arg2[%c0_1, %c0_2] : memref<16x1xf32, #tpu.memory_space<vmem>>, vector<16x1xf32>
    %c0_3 = arith.constant 0 : index
    %c0_4 = arith.constant 0 : index
    %15 = vector.load %arg3[%c0_3, %c0_4] : memref<16x1xf32, #tpu.memory_space<vmem>>, vector<16x1xf32>
    %16 = vector.broadcast %14 : vector<16x1xf32> to vector<16x256xf32>
    %17 = vector.broadcast %12 : vector<1x256xf32> to vector<16x256xf32>
    %18 = arith.mulf %16, %17 : vector<16x256xf32>
    %19 = vector.broadcast %15 : vector<16x1xf32> to vector<16x256xf32>
    %20 = arith.addf %18, %19 : vector<16x256xf32>
    %cst = arith.constant 0.000000e+00 : f32
    %21 = vector.broadcast %cst : f32 to vector<16x256xf32>
    %22 = arith.maximumf %20, %21 : vector<16x256xf32>
    %23 = arith.truncf %22 : vector<16x256xf32> to vector<16x256xbf16>
    %24 = vector.broadcast %14 : vector<16x1xf32> to vector<16x256xf32>
    %25 = vector.broadcast %13 : vector<1x256xf32> to vector<16x256xf32>
    %26 = arith.mulf %24, %25 : vector<16x256xf32>
    %27 = vector.broadcast %15 : vector<16x1xf32> to vector<16x256xf32>
    %28 = arith.addf %26, %27 : vector<16x256xf32>
    %cst_5 = arith.constant 0.000000e+00 : f32
    %29 = vector.broadcast %cst_5 : f32 to vector<16x256xf32>
    %30 = arith.maximumf %28, %29 : vector<16x256xf32>
    %31 = arith.truncf %30 : vector<16x256xf32> to vector<16x256xbf16>
    %c0_6 = arith.constant 0 : index
    %c0_7 = arith.constant 0 : index
    %32 = vector.load %arg4[%c0_6, %c0_7] : memref<32x16xbf16, #tpu.memory_space<vmem>>, vector<32x16xbf16>
    %cst_8 = arith.constant dense<0.000000e+00> : vector<32x256xf32>
    %33 = tpu.matmul %32, %23, %cst_8 {dimension_numbers = #tpu.dot_dimension_numbers<[1], [0], [0], [1], [0, 0, 1, 1], [], []>} : vector<32x16xbf16>, vector<16x256xbf16>, vector<32x256xf32> -> vector<32x256xf32>
    %cst_9 = arith.constant dense<0.000000e+00> : vector<32x256xf32>
    %34 = tpu.matmul %32, %31, %cst_9 {dimension_numbers = #tpu.dot_dimension_numbers<[1], [0], [0], [1], [0, 0, 1, 1], [], []>} : vector<32x16xbf16>, vector<16x256xbf16>, vector<32x256xf32> -> vector<32x256xf32>
    %35 = arith.maximumf %33, %34 : vector<32x256xf32>
    %36 = arith.truncf %35 : vector<32x256xf32> to vector<32x256xbf16>
    %c0_10 = arith.constant 0 : index
    %c0_11 = arith.constant 0 : index
    %37 = vector.load %arg5[%c0_10, %c0_11] : memref<16x32xbf16, #tpu.memory_space<vmem>>, vector<16x32xbf16>
    %cst_12 = arith.constant dense<0.000000e+00> : vector<16x256xf32>
    %38 = tpu.matmul %37, %36, %cst_12 {dimension_numbers = #tpu.dot_dimension_numbers<[1], [0], [0], [1], [0, 0, 1, 1], [], []>} : vector<16x32xbf16>, vector<32x256xbf16>, vector<16x256xf32> -> vector<16x256xf32>
    %c0_13 = arith.constant 0 : index
    %c0_14 = arith.constant 0 : index
    %39 = vector.load %arg6[%c0_13, %c0_14] : memref<16x1xf32, #tpu.memory_space<vmem>>, vector<16x1xf32>
    %40 = vector.broadcast %39 : vector<16x1xf32> to vector<16x256xf32>
    %41 = arith.addf %38, %40 : vector<16x256xf32>
    %cst_15 = arith.constant 0.000000e+00 : f32
    %42 = vector.broadcast %cst_15 : f32 to vector<16x256xf32>
    %43 = arith.maximumf %41, %42 : vector<16x256xf32>
    %44 = arith.truncf %43 : vector<16x256xf32> to vector<16x256xbf16>
    %c0_16 = arith.constant 0 : index
    %c0_17 = arith.constant 0 : index
    %45 = vector.load %arg7[%c0_16, %c0_17] : memref<2x16xbf16, #tpu.memory_space<vmem>>, vector<2x16xbf16>
    %cst_18 = arith.constant dense<0.000000e+00> : vector<2x256xf32>
    %46 = tpu.matmul %45, %44, %cst_18 {dimension_numbers = #tpu.dot_dimension_numbers<[1], [0], [0], [1], [0, 0, 1, 1], [], []>} : vector<2x16xbf16>, vector<16x256xbf16>, vector<2x256xf32> -> vector<2x256xf32>
    %c0_19 = arith.constant 0 : index
    %c0_20 = arith.constant 0 : index
    %47 = vector.load %arg8[%c0_19, %c0_20] : memref<2x1xf32, #tpu.memory_space<vmem>>, vector<2x1xf32>
    %48 = vector.broadcast %47 : vector<2x1xf32> to vector<2x256xf32>
    %49 = arith.addf %46, %48 : vector<2x256xf32>
    %50 = vector.extract_strided_slice %49 {offsets = [0, 0], sizes = [1, 256], strides = [1, 1]} : vector<2x256xf32> to vector<1x256xf32>
    %51 = vector.extract_strided_slice %49 {offsets = [1, 0], sizes = [1, 256], strides = [1, 1]} : vector<2x256xf32> to vector<1x256xf32>
    %52 = arith.select %5, %50, %51 : vector<1x256xi1>, vector<1x256xf32>
    %c0_21 = arith.constant 0 : index
    %c0_22 = arith.constant 0 : index
    %53 = vector.load %arg9[%c0_21, %c0_22] : memref<1x256xf32, #tpu.memory_space<vmem>>, vector<1x256xf32>
    tpu.vector_store %arg9[%c0_21, %c0_22], %52 {strides = array<i32>} : memref<1x256xf32, #tpu.memory_space<vmem>>, vector<1x256xf32>,
    return
  }
  func.func @transform_0(%arg0: i32) -> (i32, i32) {
    %c0_i32 = arith.constant 0 : i32
    %c0_i32_0 = arith.constant 0 : i32
    return %c0_i32, %arg0 : i32, i32
  }
  func.func @transform_1(%arg0: i32) -> (i32, i32) {
    %c0_i32 = arith.constant 0 : i32
    %c0_i32_0 = arith.constant 0 : i32
    %c0_i32_1 = arith.constant 0 : i32
    return %c0_i32, %c0_i32_0 : i32, i32
  }
  func.func @transform_2(%arg0: i32) -> (i32, i32) {
    %c0_i32 = arith.constant 0 : i32
    %c0_i32_0 = arith.constant 0 : i32
    %c0_i32_1 = arith.constant 0 : i32
    return %c0_i32, %c0_i32_0 : i32, i32
  }
  func.func @transform_3(%arg0: i32) -> (i32, i32) {
    %c0_i32 = arith.constant 0 : i32
    %c0_i32_0 = arith.constant 0 : i32
    %c0_i32_1 = arith.constant 0 : i32
    return %c0_i32, %c0_i32_0 : i32, i32
  }
  func.func @transform_4(%arg0: i32) -> (i32, i32) {
    %c0_i32 = arith.constant 0 : i32
    %c0_i32_0 = arith.constant 0 : i32
    %c0_i32_1 = arith.constant 0 : i32
    return %c0_i32, %c0_i32_0 : i32, i32
  }
  func.func @transform_5(%arg0: i32) -> (i32, i32) {
    %c0_i32 = arith.constant 0 : i32
    %c0_i32_0 = arith.constant 0 : i32
    %c0_i32_1 = arith.constant 0 : i32
    return %c0_i32, %c0_i32_0 : i32, i32
  }
  func.func @transform_6(%arg0: i32) -> (i32, i32) {
    %c0_i32 = arith.constant 0 : i32
    %c0_i32_0 = arith.constant 0 : i32
    %c0_i32_1 = arith.constant 0 : i32
    return %c0_i32, %c0_i32_0 : i32, i32
  }
  func.func @transform_7(%arg0: i32) -> (i32, i32) {
    %c0_i32 = arith.constant 0 : i32
    %c0_i32_0 = arith.constant 0 : i32
    %c0_i32_1 = arith.constant 0 : i32
    return %c0_i32, %c0_i32_0 : i32, i32
  }
  func.func @transform_8(%arg0: i32) -> (i32, i32) {
    %c0_i32 = arith.constant 0 : i32
    %c0_i32_0 = arith.constant 0 : i32
    return %c0_i32, %arg0 : i32, i32
  }
}

</mosaic_0001>

<bundles_post_ra>
// kernel: squeeze.1
= control target key start
LH: loop header
LB: loop body
LE: loop exit
PB: predicated region body
PF: predicated region fallthrough
CT: control target
= control target key end

     0   :  { %s66_s8 = smov 122   ;;  %vm7_vm0 = vcmask 15360   ;;  %s67_s11 = smov 124   ;;  %s117_s0 = inlined_call_operand.vmem [shape: f32[16], index: 0, kind: input, shape index: {}]   ;;  %s118_s1 = inlined_call_operand.vmem [shape: f32[8,2], index: 1, kind: output, shape index: {}]  }
   0x1   :  { %v4_v0 = vld [vmem:[%s117_s0] sm:$0x1]  ;;  %s65_s0 = smov 126   ;;  %s68_s12 = smov 120  }
   0x2   :  { %5 = vst [vmem:[#allocation0] sm:$0x1] %v4_v0  ;;  %s69_s13 = smov 118   ;;  %s70_s14 = smov 116  }
   0x3   :  { %s71_s15 = smov 114  }
   0x9   :  { %v9_v1 = vld [vmem:[#allocation0] sm:$0x1]  }
   0xa   :  { %v21_v2 = vld [vmem:[#allocation0] sm:$0x1]   ;;  %10 = vrot.lane.b32.xlu0 %v9_v1, %s65_s0 }
   0xb   :  { %22 = vrot.lane.b32.xlu1 %v21_v2, %s66_s8  ;;  %v15_v3 = vld [vmem:[#allocation0] sm:$0x1]  }
   0xc   :  { %v27_v4 = vld [vmem:[#allocation0] sm:$0x1]  }
   0xd   :  { %v6_v5 = vld [vmem:[#allocation0] sm:$0x1]  }
   0xe   :  { %8 = vst.msk [vmem:[%s118_s1] sm:$0x1] %vm7_vm0, %v6_v5   ;;  %16 = vrot.lane.b32.xlu0 %v15_v3, %s67_s11  ;;  %v33_v6 = vld [vmem:[#allocation0] sm:$0x1]  }
   0xf   :  { %28 = vrot.lane.b32.xlu1 %v27_v4, %s68_s12  ;;  %v39_v7 = vld [vmem:[#allocation0] sm:$0x1]  }
  0x10   :  { %v45_v8 = vld [vmem:[#allocation0] sm:$0x1]  }
  0x12   :  { %34 = vrot.lane.b32.xlu0 %v33_v6, %s69_s13 }
  0x13   :  { %40 = vrot.lane.b32.xlu1 %v39_v7, %s70_s14 }
  0x16   :  { %46 = vrot.lane.b32.xlu0 %v45_v8, %s71_s15 }
  0x7c   :  { %v11_v9 = vpop.permute.xlu0 %10  }
  0x7d   :  { %v23_v10 = vpop.permute.xlu1 %22   ;;  %51 = vst.msk [vmem:[%s118_s1 + $0x1] sm:$0x1] %vm7_vm0, %v11_v9  }
  0x7e   :  { %53 = vst.msk [vmem:[%s118_s1 + $0x3] sm:$0x1] %vm7_vm0, %v23_v10  }
  0x80   :  { %v17_v11 = vpop.permute.xlu0 %16  }
  0x81   :  { %v29_v12 = vpop.permute.xlu1 %28   ;;  %52 = vst.msk [vmem:[%s118_s1 + $0x2] sm:$0x1] %vm7_vm0, %v17_v11  }
  0x82   :  { %54 = vst.msk [vmem:[%s118_s1 + $0x4] sm:$0x1] %vm7_vm0, %v29_v12  }
  0x84   :  { %v35_v13 = vpop.permute.xlu0 %34  }
  0x85   :  { %v41_v14 = vpop.permute.xlu1 %40   ;;  %55 = vst.msk [vmem:[%s118_s1 + $0x5] sm:$0x1] %vm7_vm0, %v35_v13  }
  0x86   :  { %56 = vst.msk [vmem:[%s118_s1 + $0x6] sm:$0x1] %vm7_vm0, %v41_v14  }
  0x88   :  { %v47_v15 = vpop.permute.xlu0 %46  }
  0x89   :  { %57 = vst.msk [vmem:[%s118_s1 + $0x7] sm:$0x1] %vm7_vm0, %v47_v15  }

// kernel: net_forward.1
= control target key start
LH: loop header
LB: loop body
LE: loop exit
PB: predicated region body
PF: predicated region fallthrough
CT: control target
= control target key end

     0   :  { %v31_v0 = vlaneseq  ;;  %v456_v1 = vmov 0   ;;  %vm52_vm0 = vcmask 7168   ;;  %vm61_vm3 = vcmask 1039360   ;;  %s585_s2 = inlined_call_operand.vmem [shape: f32[16,1], index: 2, kind: input, shape index: {}]   ;;  %s586_s1 = inlined_call_operand.vmem [shape: f32[16,1], index: 1, kind: input, shape index: {}]   ;;  %s587_s0 = inlined_call_operand.vmem [shape: f32[1,256], index: 0, kind: input, shape index: {}]   ;;  %s588_s5 = inlined_call_operand.vmem [shape: f32[16,1], index: 5, kind: input, shape index: {}]   ;;  %s589_s7 = inlined_call_operand.vmem [shape: f32[2,1], index: 7, kind: input, shape index: {}]   ;;  %s590_s3 = inlined_call_operand.vmem [shape: bf16[32,16], index: 3, kind: input, shape index: {}]   ;;  %s591_s4 = inlined_call_operand.vmem [shape: bf16[16,32], index: 4, kind: input, shape index: {}]   ;;  %s592_s6 = inlined_call_operand.vmem [shape: bf16[2,16], index: 6, kind: input, shape index: {}]   ;;  %s593_s8 = inlined_call_operand.vmem [shape: f32[1,256], index: 8, kind: output, shape index: {}]  }
   0x1   :  { %452 = vset.pattern.permute.xlu1 %v456_v1  ;;  %451 = vset.pattern.permute.xlu0 %v456_v1  ;;  %v75_v2 = vld [vmem:[%s585_s2] sm:$0xff]  ;;  %v76_v5 = vld [vmem:[%s585_s2 + $0x8] sm:$0xff]  ;;  %s457_s2 = smov 1   ;;  %vm155_vm4 = vcmask 130048   ;;  %vm299_vm5 = vcmask 261120  }
   0x2   :  { %v73_v3 = vld [vmem:[%s586_s1] sm:$0xff]  ;;  %101 = vperm.xlu1 %452, %v75_v2   ;;  %v514_v4 = vshrl.u32 %v31_v0, 7  ;;  %v74_v6 = vld [vmem:[%s586_s1 + $0x8] sm:$0xff]  ;;  %194 = vmatprep.mubr.bf16.mxu0 %v456_v1  ;;  %s458_s1 = smov 127   ;;  %v32_v15 = vand.u32 127, %v31_v0  ;;  %vm431_vm6 = vcmp.lt.s32.totalorder %v31_v0, 256 }
   0x3   :  { %79 = vperm.xlu0 %451, %v73_v3   ;;  %v30_v7 = vld [vmem:[%s587_s0] sm:$0x3]  ;;  %247 = vmatprep.mubr.bf16.mxu1 %v456_v1  ;;  %v283_v12 = vld [vmem:[%s588_s5 + $0x8] sm:$0xff] }
   0x4   :  { %v48_v8 = vsub.s32 0, %v514_v4  ;;  %v41_v9 = vsub.s32 1, %v514_v4  ;;  %v282_v13 = vld [vmem:[%s588_s5] sm:$0xff]  ;;  %v33_v16 = vadd.s32 128, %v32_v15  ;;  %v34_v19 = vand.u32 1, %v32_v15 }
   0x5   :  { %v353_v14 = vld [vmem:[%s589_s7] sm:$0x3] }
   0x6   :  { %106 = vperm.xlu1 %452, %v76_v5   ;;  %v49_v10 = vrot.slane %v30_v7, %v48_v8  ;;  %v42_v11 = vrot.slane %v30_v7, %v41_v9  ;;  %v35_v20 = vand.u32 1, %v33_v16  ;;  %vm539_vm1 = vcmp.eq.s32.totalorder %v34_v19, 0  ;;  %v453_v3 = vld [vmem:[%s590_s3] sm:$0xff]   ;;  %v454_v9 = vld [vmem:[%s590_s3 + $0x8] sm:$0xff]  }
   0x7   :  { %84 = vperm.xlu0 %451, %v74_v6  }
   0x8   :  { %vm543_vm2 = vcmp.eq.s32.totalorder %v35_v20, 0 }
   0xa   :  { %50 = vrot.lane.b32.xlu1 %v49_v10, %s457_s2 }
   0xb   :  { %43 = vrot.lane.b32.xlu0 %v42_v11, %s457_s2 }
   0xe   :  { %59 = vrot.lane.b32.xlu1 %v42_v11, %s458_s1 }
   0xf   :  { %57 = vrot.lane.b32.xlu0 %v49_v10, %s458_s1 }
  0x12   :  { %291 = vperm.xlu1 %452, %v283_v12  }
  0x13   :  { %286 = vperm.xlu0 %451, %v282_v13  }
  0x17   :  { %356 = vperm.xlu0 %451, %v353_v14  }
  0x81   :  { %v102_v17 = vpop.permute.xlu1 %101 }
  0x82   :  { %v80_v18 = vpop.permute.xlu0 %79 }
  0x85   :  { %v107_v21 = vpop.permute.xlu1 %106 }
  0x86   :  { %v85_v22 = vpop.permute.xlu0 %84 }
  0x89   :  { %v51_v25 = vpop.permute.xlu1 %50 }
  0x8a   :  { %v44_v26 = vpop.permute.xlu0 %43 }
  0x8b   :  { %v53_v27 = vsel %vm52_vm0, %v51_v25, %v44_v26  ;;  %v56_v28 = vsel %vm52_vm0, %v44_v26, %v51_v25 }
  0x8c   :  { %v69_v29 = vsel %vm539_vm1, %v49_v10, %v56_v28  ;;  %v70_v30 = vsel %vm543_vm2, %v42_v11, %v53_v27 }
  0x8d   :  { %v90_v31 = vrot.slane %v69_v29, %v48_v8  ;;  %v94_v32 = vrot.slane %v70_v30, %v48_v8  ;;  %v60_v33 = vpop.permute.xlu1 %59 }
  0x8e   :  { %v58_v34 = vpop.permute.xlu0 %57 }
  0x8f   :  { %v62_v35 = vsel %vm61_vm3, %v58_v34, %v60_v33  ;;  %v66_v36 = vsel %vm61_vm3, %v60_v33, %v58_v34  ;;  %v96_v37 = vmul.f32 %v94_v32, %v80_v18  ;;  %v98_v38 = vmul.f32 %v94_v32, %v85_v22 }
  0x90   :  { %v71_v39 = vsel %vm539_vm1, %v62_v35, %v49_v10  ;;  %v72_v40 = vsel %vm543_vm2, %v66_v36, %v42_v11  ;;  %v95_v41 = vmul.f32 %v90_v31, %v80_v18  ;;  %v97_v42 = vmul.f32 %v90_v31, %v85_v22 }
  0x91   :  { %v122_v43 = vrot.slane %v71_v39, %v48_v8  ;;  %v126_v44 = vrot.slane %v72_v40, %v48_v8  ;;  %v110_v45 = vadd.f32 %v102_v17, %v96_v37  ;;  %v112_v46 = vadd.f32 %v107_v21, %v98_v38  ;;  %v455_v39 = vld [vmem:[%s591_s4] sm:$0xff]  }
  0x92   :  { %v109_v47 = vadd.f32 %v102_v17, %v95_v41  ;;  %v111_v48 = vadd.f32 %v107_v21, %v97_v42  ;;  %v287_v40 = vpop.permute.xlu0 %286 }
  0x93   :  { %v114_v49 = vmax.f32 %v110_v45, 0.0  ;;  %v116_v50 = vmax.f32 %v112_v46, 0.0  ;;  %v128_v51 = vmul.f32 %v126_v44, %v80_v18  ;;  %v130_v52 = vmul.f32 %v126_v44, %v85_v22  ;;  %v292_v44 = vpop.permute.xlu1 %291 }
  0x94   :  { %v113_v53 = vmax.f32 %v109_v47, 0.0  ;;  %v115_v54 = vmax.f32 %v111_v48, 0.0  ;;  %v127_v55 = vmul.f32 %v122_v43, %v80_v18  ;;  %v129_v56 = vmul.f32 %v122_v43, %v85_v22 }
  0x95   :  { %v118_v57 = vpack.c.bf16 %v116_v50, %v114_v49  ;;  %v132_v58 = vadd.f32 %v128_v51, %v102_v17  ;;  %v134_v59 = vadd.f32 %v130_v52, %v107_v21 }
  0x96   :  { %v117_v60 = vpack.c.bf16 %v115_v54, %v113_v53  ;;  %v131_v61 = vadd.f32 %v127_v55, %v102_v17  ;;  %v133_v62 = vadd.f32 %v129_v56, %v107_v21  ;;  %v352_v56 = vld [vmem:[%s592_s6] sm:$0x1] }
  0x97   :  { %162 = vmatprep.subr.bf16.mxu0 %v118_v57  ;;  %v136_v63 = vmax.f32 %v132_v58, 0.0  ;;  %v138_v2 = vmax.f32 %v134_v59, 0.0  ;;  %v459_v57 = vmov 1966171168   ;;  %v357_v59 = vpop.permute.xlu0 %356 }
  0x98   :  { %163 = vmatpush1.bf16.msra.mxu0 %v117_v60  ;;  %v135_v5 = vmax.f32 %v131_v61, 0.0  ;;  %v137_v6 = vmax.f32 %v133_v62, 0.0  ;;  %v415_v58 = vunpack.c.l.s4 %v459_v57 }
  0x99   :  { %v140_v7 = vpack.c.bf16 %v138_v2, %v136_v63 }
  0x9a   :  { %v139_v8 = vpack.c.bf16 %v137_v6, %v135_v5  ;;  %v416_v63 = vunpack.c.0.s8 %v415_v58 }
  0x9b   :  { %215 = vmatprep.subr.bf16.mxu1 %v140_v7  ;;  %440 = vmatmul.mubr.msk.bf16.vlgmr.msra.gmra.mrb[0].mxu0 %vm155_vm4, %v453_v3 }
  0x9c   :  { %216 = vmatpush1.bf16.msra.mxu1 %v139_v8  ;;  %204 = vmatprep.mubr.bf16.mxu0 %v456_v1 }
  0x9f   :  { %442 = vmatmul.mubr.msk.bf16.vlgmr.msra.gmra.mrb[0].mxu1 %vm155_vm4, %v453_v3 }
  0xa0   :  { %257 = vmatprep.mubr.bf16.mxu1 %v456_v1 }
  0xa3   :  { %441 = vmatmul.mubr.msk.bf16.gmra.mrb[4].mxu0 %vm155_vm4, %v454_v9 }
  0xa4   :  { %335 = vmatprep.mubr.bf16.mxu0 %v456_v1 }
  0xa7   :  { %443 = vmatmul.mubr.msk.bf16.gmra.mrb[4].mxu1 %vm155_vm4, %v454_v9  ;;  %v419_v9 = vsub.s32 %v416_v63, %v514_v4 }
  0xa8   :  { %394 = vmatprep.mubr.bf16.mxu1 %v456_v1 }
 0x16e   :  { %v196_v10 = vpop.f32.mrb[0].mxu0 }
 0x16f   :  { %v198_v11 = vpop.f32.mrb[1].mxu0 }
 0x170   :  { %v200_v12 = vpop.f32.mrb[2].mxu0 }
 0x171   :  { %v202_v13 = vpop.f32.mrb[3].mxu0 }
 0x172   :  { %v249_v14 = vpop.f32.mrb[0].mxu1 }
 0x173   :  { %v268_v15 = vmax.f32 %v196_v10, %v249_v14  ;;  %v251_v16 = vpop.f32.mrb[1].mxu1 }
 0x174   :  { %v269_v17 = vmax.f32 %v198_v11, %v251_v16  ;;  %v253_v18 = vpop.f32.mrb[2].mxu1 }
 0x175   :  { %v270_v19 = vmax.f32 %v200_v12, %v253_v18  ;;  %v255_v20 = vpop.f32.mrb[3].mxu1 }
 0x176   :  { %v271_v21 = vmax.f32 %v202_v13, %v255_v20  ;;  %v206_v22 = vpop.f32.mrb[4].mxu0 }
 0x177   :  { %v276_v25 = vpack.c.bf16 %v270_v19, %v268_v15  ;;  %v208_v26 = vpop.f32.mrb[5].mxu0 }
 0x178   :  { %v277_v27 = vpack.c.bf16 %v271_v21, %v269_v17  ;;  %v210_v28 = vpop.f32.mrb[6].mxu0 }
 0x179   :  { %v212_v29 = vpop.f32.mrb[7].mxu0 }
 0x17a   :  { %v259_v30 = vpop.f32.mrb[4].mxu1  ;;  %303 = vmatprep.subr.bf16.mxu0 %v277_v27 }
 0x17b   :  { %v272_v1 = vmax.f32 %v206_v22, %v259_v30  ;;  %v261_v31 = vpop.f32.mrb[5].mxu1  ;;  %304 = vmatpush1.bf16.msra.mxu0 %v276_v25 }
 0x17c   :  { %v273_v32 = vmax.f32 %v208_v26, %v261_v31  ;;  %v263_v33 = vpop.f32.mrb[6].mxu1 }
 0x17d   :  { %v274_v34 = vmax.f32 %v210_v28, %v263_v33  ;;  %v265_v35 = vpop.f32.mrb[7].mxu1 }
 0x17e   :  { %v275_v36 = vmax.f32 %v212_v29, %v265_v35 }
 0x17f   :  { %v278_v37 = vpack.c.bf16 %v274_v34, %v272_v1 }
 0x180   :  { %v279_v38 = vpack.c.bf16 %v275_v36, %v273_v32 }
 0x182   :  { %305 = vmatprep.subr.bf16.mxu0 %v279_v38 }
 0x183   :  { %306 = vmatpush1.bf16.msra.mxu0 %v278_v37 }
 0x186   :  { %445 = vmatmul.mubr.msk.bf16.vlgmr.msra.gmra.mrb[8].mxu0 %vm299_vm5, %v455_v39 }
 0x259   :  { %v337_v41 = vpop.f32.mrb[8].mxu0 }
 0x25a   :  { %v338_v42 = vadd.f32 %v337_v41, %v287_v40  ;;  %v339_v43 = vpop.f32.mrb[9].mxu0 }
 0x25b   :  { %v340_v45 = vadd.f32 %v339_v43, %v287_v40  ;;  %v341_v46 = vpop.f32.mrb[10].mxu0 }
 0x25c   :  { %v342_v47 = vadd.f32 %v341_v46, %v292_v44  ;;  %v343_v48 = vpop.f32.mrb[11].mxu0  ;;  %v346_v50 = vmax.f32 %v338_v42, 0.0 }
 0x25d   :  { %v344_v49 = vadd.f32 %v343_v48, %v292_v44  ;;  %v347_v52 = vmax.f32 %v340_v45, 0.0 }
 0x25e   :  { %v348_v51 = vmax.f32 %v342_v47, 0.0 }
 0x25f   :  { %v349_v53 = vmax.f32 %v344_v49, 0.0 }
 0x260   :  { %v350_v54 = vpack.c.bf16 %v348_v51, %v346_v50 }
 0x261   :  { %v351_v55 = vpack.c.bf16 %v349_v53, %v347_v52 }
 0x263   :  { %362 = vmatprep.subr.bf16.mxu1 %v351_v55 }
 0x264   :  { %363 = vmatpush1.bf16.msra.mxu1 %v350_v54 }
 0x267   :  { %446 = vmatmul.mubr.msk.bf16.vlgmr.msra.gmra.mrb[8].mxu1 %vm155_vm4, %v352_v56 }
 0x33a   :  { %v396_v60 = vpop.f32.mrb[8].mxu1 }
 0x33b   :  { %v397_v61 = vadd.f32 %v396_v60, %v357_v59  ;;  %v398_v62 = vpop.f32.mrb[9].mxu1 }
 0x33c   :  { %v399_v2 = vadd.f32 %v398_v62, %v357_v59  ;;  %v400_v3 = vpop.f32.mrb[10].mxu1 }
 0x33d   :  { %v405_v5 = vrot.slane %v397_v61, 1  ;;  %v401_v6 = vpop.f32.mrb[11].mxu1 }
 0x33e   :  { %v406_v7 = vrot.slane %v399_v2, 1 }
 0x33f   :  { %v409_v8 = vsel %vm539_vm1, %v397_v61, %v405_v5 }
 0x340   :  { %v410_v10 = vsel %vm543_vm2, %v399_v2, %v406_v7 }
 0x341   :  { %v413_v11 = vcombine.low %v409_v8, %v410_v10 }
 0x343   :  { %v420_v12 = vrot.slane %v413_v11, %v419_v9 }
 0x345   :  { %v427_v13 = vrot.slane %v420_v12, %v419_v9 }
 0x347   :  { %433 = vst.msk [vmem:[%s593_s8] sm:$0x3] %vm431_vm6, %v427_v13 }

</bundles_post_ra>
